<compile_context>
chip_gen: v7x
topology: tpu7x:2x2x1
jax: 0.10.0
libtpu: 0.0.40
codegen_flags: <defaults>
</compile_context>

<pallas_src>
import math

import jax
import jax.numpy as jnp
from jax.experimental import pallas as pl
from jax.experimental.pallas import tpu as pltpu

_INV_SQRT2 = 0.7071067811865476


def _gelu_erf(h):
    # exact (erf) GELU in f32 -- matches torch.nn.GELU() default numerics.
    return 0.5 * h * (1.0 + jax.lax.erf(h * _INV_SQRT2))


def _mlp_kernel_fused(x_ref, w1_ref, b1_ref, w2_ref, b2_ref, o_ref):
    # Whole hidden dim resident: single pass, no accumulator scratch.
    h = jnp.dot(x_ref[...], w1_ref[...], preferred_element_type=jnp.float32)
    h = _gelu_erf(h + b1_ref[...].astype(jnp.float32))
    # dropout(p=0.0) == identity -> skipped
    y = jnp.dot(h.astype(w2_ref.dtype), w2_ref[...],
                preferred_element_type=jnp.float32)
    o_ref[...] = (y + b2_ref[...].astype(jnp.float32)).astype(o_ref.dtype)


def _mlp_kernel_acc(x_ref, w1_ref, b1_ref, w2_ref, b2_ref, o_ref, acc_ref):
    # grid = (M tiles, hidden tiles); hidden is the fc2 reduction axis.
    j = pl.program_id(1)

    @pl.when(j == 0)
    def _init():
        acc_ref[...] = jnp.zeros_like(acc_ref)

    # fc1 partial: (TM, in) @ (in, TH) -> f32 on the MXU
    h = jnp.dot(x_ref[...], w1_ref[...], preferred_element_type=jnp.float32)
    h = _gelu_erf(h + b1_ref[...].astype(jnp.float32))
    # dropout(p=0.0) == identity -> skipped
    # fc2 partial: (TM, TH) @ (TH, out), accumulated over hidden tiles in f32
    acc_ref[...] += jnp.dot(h.astype(w2_ref.dtype), w2_ref[...],
                            preferred_element_type=jnp.float32)

    @pl.when(j == pl.num_programs(1) - 1)
    def _finalize():
        o_ref[...] = (acc_ref[...] + b2_ref[...].astype(jnp.float32)).astype(o_ref.dtype)


def _round_up(n, m):
    return (n + m - 1) // m * m


def mlp_pallas(x, w1, b1, w2, b2, *, tm=None, th=None):
    """x: (..., in_features). w1:(in,hidden), b1:(hidden,), w2:(hidden,out), b2:(out,)."""
    orig_shape = x.shape
    in_f = orig_shape[-1]
    hid_f = w1.shape[1]
    out_f = w2.shape[1]
    assert w1.shape[0] == in_f and w2.shape[0] == hid_f
    assert b1.shape == (hid_f,) and b2.shape == (out_f,)

    x2d = x.reshape(-1, in_f)
    M = x2d.shape[0]
    itemsize = jnp.dtype(x.dtype).itemsize

    # Lane-dense (multiple-of-128) feature dims; zero padding is exact.
    in_p = _round_up(in_f, 128)
    hid_p = _round_up(hid_f, 128)
    out_p = _round_up(out_f, 128)

    budget = 36 * 1024 * 1024  # headroom under v7x's 64 MiB physical VMEM

    def vmem_usage(tm_, th_):
        streamed = 1 if th_ >= hid_p else 2              # dbl-buffer streamed weights
        w_bytes = streamed * (in_p * th_ + th_ * out_p) * itemsize
        io_bytes = 2 * tm_ * (in_p + out_p) * itemsize   # dbl-buffered x / out tiles
        scratch = tm_ * th_ * 4                          # f32 intermediate h
        if th_ < hid_p:
            scratch += tm_ * out_p * 4                   # f32 accumulator
        return w_bytes + io_bytes + scratch

    # Token-tile: biggest tile that both covers M and fits the VMEM budget.
    m_ceil = _round_up(M, 8)
    if tm is None:
        tm = 8
        for cand in (512, 256, 128, 64, 32, 16, 8):
            if cand <= m_ceil and vmem_usage(cand, min(hid_p, 2048)) <= budget:
                tm = cand
                break
    tm = max(8, min(_round_up(tm, 8), m_ceil))
    m_p = _round_up(M, tm)

    # Hidden-tile: keep the full hidden dim resident (weights stay in VMEM
    # across all M tiles, fused kernel) when it fits; otherwise stream
    # 128-multiple hidden tiles (double-buffered by the pipeline).
    if th is None:
        th = 128
        for cand in (hid_p, 4096, 2048, 1024, 512, 256, 128):
            if cand <= hid_p and vmem_usage(tm, cand) <= budget:
                th = cand
                break
    th = min(_round_up(th, 128), hid_p)
    hid_p = _round_up(hid_p, th)  # hidden tiles must divide the padded hidden dim

    # Zero-pad operands to the tiled/padded shapes (no-op when already aligned).
    def pad2(a, rows, cols):
        pr, pc = rows - a.shape[0], cols - a.shape[1]
        return a if (pr == 0 and pc == 0) else jnp.pad(a, ((0, pr), (0, pc)))

    x_p = pad2(x2d, m_p, in_p)
    w1_p = pad2(w1, in_p, hid_p)
    b1_p = pad2(b1.reshape(1, -1), 1, hid_p)
    w2_p = pad2(w2, hid_p, out_p)
    b2_p = pad2(b2.reshape(1, -1), 1, out_p)

    cost = pl.CostEstimate(
        flops=2 * M * (in_f * hid_f + hid_f * out_f),
        transcendentals=M * hid_f,
        bytes_accessed=(x2d.size + w1.size + b1.size + w2.size + b2.size
                        + M * out_f) * itemsize,
    )
    cparams = dict(vmem_limit_bytes=48 * 1024 * 1024)

    if hid_p // th == 1:
        # Fused single-pass kernel: 1-D grid over token tiles only.
        out = pl.pallas_call(
            _mlp_kernel_fused,
            out_shape=jax.ShapeDtypeStruct((m_p, out_p), x.dtype),
            grid_spec=pltpu.PrefetchScalarGridSpec(
                num_scalar_prefetch=0,
                grid=(m_p // tm,),
                in_specs=[
                    pl.BlockSpec((tm, in_p), lambda i: (i, 0)),        # x tile
                    pl.BlockSpec((in_p, hid_p), lambda i: (0, 0)),     # w1 (resident)
                    pl.BlockSpec((1, hid_p), lambda i: (0, 0)),        # b1
                    pl.BlockSpec((hid_p, out_p), lambda i: (0, 0)),    # w2 (resident)
                    pl.BlockSpec((1, out_p), lambda i: (0, 0)),        # b2
                ],
                out_specs=pl.BlockSpec((tm, out_p), lambda i: (i, 0)),
            ),
            compiler_params=pltpu.CompilerParams(
                dimension_semantics=("parallel",), **cparams),
            cost_estimate=cost,
        )(x_p, w1_p, b1_p, w2_p, b2_p)
    else:
        # Hidden dim streamed: 2-D grid, f32 accumulator over hidden tiles.
        out = pl.pallas_call(
            _mlp_kernel_acc,
            out_shape=jax.ShapeDtypeStruct((m_p, out_p), x.dtype),
            grid_spec=pltpu.PrefetchScalarGridSpec(
                num_scalar_prefetch=0,
                grid=(m_p // tm, hid_p // th),
                in_specs=[
                    pl.BlockSpec((tm, in_p), lambda i, j: (i, 0)),     # x tile
                    pl.BlockSpec((in_p, th), lambda i, j: (0, j)),     # w1 hidden tile
                    pl.BlockSpec((1, th), lambda i, j: (0, j)),        # b1 tile
                    pl.BlockSpec((th, out_p), lambda i, j: (j, 0)),    # w2 hidden tile
                    pl.BlockSpec((1, out_p), lambda i, j: (0, 0)),     # b2
                ],
                out_specs=pl.BlockSpec((tm, out_p), lambda i, j: (i, 0)),
                scratch_shapes=[pltpu.VMEM((tm, out_p), jnp.float32)],
            ),
            compiler_params=pltpu.CompilerParams(
                dimension_semantics=("parallel", "arbitrary"), **cparams),
            cost_estimate=cost,
        )(x_p, w1_p, b1_p, w2_p, b2_p)

    return out[:M, :out_f].reshape(*orig_shape[:-1], out_f)


def _reference_mlp(x, w1, b1, w2, b2):
    h = x @ w1 + b1
    h = _gelu_erf(h)
    return h @ w2 + b2


def _make_params(key, in_f, hid_f, out_f, dtype=jnp.float32):
    kw1, kb1, kw2, kb2 = jax.random.split(key, 4)
    bound1 = 1.0 / math.sqrt(in_f)
    bound2 = 1.0 / math.sqrt(hid_f)
    w1 = jax.random.uniform(kw1, (in_f, hid_f), dtype, -bound1, bound1)
    b1 = jax.random.uniform(kb1, (hid_f,), dtype, -bound1, bound1)
    w2 = jax.random.uniform(kw2, (hid_f, out_f), dtype, -bound2, bound2)
    b2 = jax.random.uniform(kb2, (out_f,), dtype, -bound2, bound2)
    return w1, b1, w2, b2


if __name__ == "__main__":
    key = jax.random.PRNGKey(0)
    kx, kp, kx2, kp2 = jax.random.split(key, 4)

    # --- aligned shapes (lane-dense, module defaults: out_features = in_features)
    batch, seq = 2, 8
    in_features, hidden_features = 128, 256
    out_features = in_features
    x = jax.random.normal(kx, (batch, seq, in_features), dtype=jnp.float32)
    w1, b1, w2, b2 = _make_params(kp, in_features, hidden_features, out_features)
    y_ref = _reference_mlp(x, w1, b1, w2, b2)

    # f32, fused (full hidden resident) path
    y = mlp_pallas(x, w1, b1, w2, b2)
    jax.block_until_ready(y)
    assert y.shape == (batch, seq, out_features)
    assert jnp.allclose(y, y_ref, atol=1e-5, rtol=1e-5), "f32 fused mismatch vs reference"

    # f32, forced hidden-streaming (accumulator) path
    y_acc = mlp_pallas(x, w1, b1, w2, b2, th=128)
    jax.block_until_ready(y_acc)
    assert jnp.allclose(y_acc, y_ref, atol=1e-5, rtol=1e-5), "f32 acc mismatch vs reference"

    # bf16-operand path (MXU-native): f32 accumulation + f32 GELU inside the kernel
    y_bf16 = mlp_pallas(
        x.astype(jnp.bfloat16), w1.astype(jnp.bfloat16), b1.astype(jnp.bfloat16),
        w2.astype(jnp.bfloat16), b2.astype(jnp.bfloat16))
    jax.block_until_ready(y_bf16)
    assert jnp.allclose(y_bf16.astype(jnp.float32), y_ref, atol=5e-2, rtol=5e-2), \
        "bf16 mismatch vs reference"

    # --- unaligned shapes: exercise the zero-padding path
    in_u, hid_u, out_u = 72, 200, 56
    xu = jax.random.normal(kx2, (batch, seq, in_u), dtype=jnp.float32)
    w1u, b1u, w2u, b2u = _make_params(kp2, in_u, hid_u, out_u)
    yu = mlp_pallas(xu, w1u, b1u, w2u, b2u)
    jax.block_until_ready(yu)
    yu_ref = _reference_mlp(xu, w1u, b1u, w2u, b2u)
    assert yu.shape == (batch, seq, out_u)
    assert jnp.allclose(yu, yu_ref, atol=1e-5, rtol=1e-5), "padded-path mismatch vs reference"

    print("KERNEL_OK")
</pallas_src>

<mosaic_0001>
module attributes {stable_mosaic.version = 11 : i64} {
  func.func @_mlp_kernel_fused(%arg0: i32, %arg1: memref<16x128xf32, #tpu.memory_space<vmem>>, %arg2: memref<128x256xf32, #tpu.memory_space<vmem>>, %arg3: memref<1x256xf32, #tpu.memory_space<vmem>>, %arg4: memref<256x128xf32, #tpu.memory_space<vmem>>, %arg5: memref<1x128xf32, #tpu.memory_space<vmem>>, %arg6: memref<16x128xf32, #tpu.memory_space<vmem>>) attributes {dimension_semantics = [#tpu.dimension_semantics<parallel>], iteration_bounds = array<i64: 1>, scalar_prefetch = 0 : i64, scratch_operands = 0 : i64, tpu.core_type = #tpu.core_type<tc>, window_params = [{transform_indices = @transform_0, window_bounds = array<i64: 16, 128>}, {pipeline_mode = #tpu.pipeline_mode<synchronous>, transform_indices = @transform_1, window_bounds = array<i64: 128, 256>}, {pipeline_mode = #tpu.pipeline_mode<synchronous>, transform_indices = @transform_2, window_bounds = array<i64: 1, 256>}, {pipeline_mode = #tpu.pipeline_mode<synchronous>, transform_indices = @transform_3, window_bounds = array<i64: 256, 128>}, {pipeline_mode = #tpu.pipeline_mode<synchronous>, transform_indices = @transform_4, window_bounds = array<i64: 1, 128>}, {transform_indices = @transform_5, window_bounds = array<i64: 16, 128>}]} {
    %c0 = arith.constant 0 : index
    %c0_0 = arith.constant 0 : index
    %0 = vector.load %arg1[%c0, %c0_0] : memref<16x128xf32, #tpu.memory_space<vmem>>, vector<16x128xf32>
    %c0_1 = arith.constant 0 : index
    %c0_2 = arith.constant 0 : index
    %1 = vector.load %arg2[%c0_1, %c0_2] : memref<128x256xf32, #tpu.memory_space<vmem>>, vector<128x256xf32>
    %cst = arith.constant dense<0.000000e+00> : vector<16x256xf32>
    %2 = tpu.matmul %0, %1, %cst {dimension_numbers = #tpu.dot_dimension_numbers<[1], [0], [0], [1], [0, 0, 1, 1], [], []>} : vector<16x128xf32>, vector<128x256xf32>, vector<16x256xf32> -> vector<16x256xf32>
    %c0_3 = arith.constant 0 : index
    %c0_4 = arith.constant 0 : index
    %3 = vector.load %arg3[%c0_3, %c0_4] : memref<1x256xf32, #tpu.memory_space<vmem>>, vector<1x256xf32>
    %4 = vector.broadcast %3 : vector<1x256xf32> to vector<16x256xf32>
    %5 = arith.addf %2, %4 : vector<16x256xf32>
    %cst_5 = arith.constant 5.000000e-01 : f32
    %6 = vector.broadcast %cst_5 : f32 to vector<16x256xf32>
    %7 = arith.mulf %6, %5 : vector<16x256xf32>
    %cst_6 = arith.constant 0.707106769 : f32
    %8 = vector.broadcast %cst_6 : f32 to vector<16x256xf32>
    %9 = arith.mulf %5, %8 : vector<16x256xf32>
    %10 = math.erf %9 : vector<16x256xf32>
    %cst_7 = arith.constant 1.000000e+00 : f32
    %11 = vector.broadcast %cst_7 : f32 to vector<16x256xf32>
    %12 = arith.addf %11, %10 : vector<16x256xf32>
    %13 = arith.mulf %7, %12 : vector<16x256xf32>
    %c0_8 = arith.constant 0 : index
    %c0_9 = arith.constant 0 : index
    %14 = vector.load %arg4[%c0_8, %c0_9] : memref<256x128xf32, #tpu.memory_space<vmem>>, vector<256x128xf32>
    %cst_10 = arith.constant dense<0.000000e+00> : vector<16x128xf32>
    %15 = tpu.matmul %13, %14, %cst_10 {dimension_numbers = #tpu.dot_dimension_numbers<[1], [0], [0], [1], [0, 0, 1, 1], [], []>} : vector<16x256xf32>, vector<256x128xf32>, vector<16x128xf32> -> vector<16x128xf32>
    %c0_11 = arith.constant 0 : index
    %c0_12 = arith.constant 0 : index
    %16 = vector.load %arg5[%c0_11, %c0_12] : memref<1x128xf32, #tpu.memory_space<vmem>>, vector<1x128xf32>
    %17 = vector.broadcast %16 : vector<1x128xf32> to vector<16x128xf32>
    %18 = arith.addf %15, %17 : vector<16x128xf32>
    %c0_13 = arith.constant 0 : index
    %c0_14 = arith.constant 0 : index
    %19 = vector.load %arg6[%c0_13, %c0_14] : memref<16x128xf32, #tpu.memory_space<vmem>>, vector<16x128xf32>
    tpu.vector_store %arg6[%c0_13, %c0_14], %18 {strides = array<i32>} : memref<16x128xf32, #tpu.memory_space<vmem>>, vector<16x128xf32>,
    return
  }
  func.func @transform_0(%arg0: i32) -> (i32, i32) {
    %c0_i32 = arith.constant 0 : i32
    %c0_i32_0 = arith.constant 0 : i32
    return %arg0, %c0_i32 : i32, i32
  }
  func.func @transform_1(%arg0: i32) -> (i32, i32) {
    %c0_i32 = arith.constant 0 : i32
    %c0_i32_0 = arith.constant 0 : i32
    %c0_i32_1 = arith.constant 0 : i32
    return %c0_i32, %c0_i32_0 : i32, i32
  }
  func.func @transform_2(%arg0: i32) -> (i32, i32) {
    %c0_i32 = arith.constant 0 : i32
    %c0_i32_0 = arith.constant 0 : i32
    %c0_i32_1 = arith.constant 0 : i32
    return %c0_i32, %c0_i32_0 : i32, i32
  }
  func.func @transform_3(%arg0: i32) -> (i32, i32) {
    %c0_i32 = arith.constant 0 : i32
    %c0_i32_0 = arith.constant 0 : i32
    %c0_i32_1 = arith.constant 0 : i32
    return %c0_i32, %c0_i32_0 : i32, i32
  }
  func.func @transform_4(%arg0: i32) -> (i32, i32) {
    %c0_i32 = arith.constant 0 : i32
    %c0_i32_0 = arith.constant 0 : i32
    %c0_i32_1 = arith.constant 0 : i32
    return %c0_i32, %c0_i32_0 : i32, i32
  }
  func.func @transform_5(%arg0: i32) -> (i32, i32) {
    %c0_i32 = arith.constant 0 : i32
    %c0_i32_0 = arith.constant 0 : i32
    return %arg0, %c0_i32 : i32, i32
  }
}

</mosaic_0001>

<bundles_post_ra>
// kernel: tpu_custom_call.1
= control target key start
LH: loop header
LB: loop body
LE: loop exit
PB: predicated region body
PF: predicated region fallthrough
CT: control target
= control target key end

     0   :  { %10 = vsyncpa [#allocation3], 0  ;;  %s657_s0 = inlined_call_operand.hbm [shape: f32[16,128], index: 0, kind: input, shape index: {}]   ;;  %s658_s1 = inlined_call_operand.hbm [shape: f32[128,256], index: 1, kind: input, shape index: {}]   ;;  %s659_s2 = inlined_call_operand.vmem [shape: f32[1,256], index: 2, kind: input, shape index: {}]   ;;  %s660_s3 = inlined_call_operand.hbm [shape: f32[256,128], index: 3, kind: input, shape index: {}]   ;;  %s661_s4 = inlined_call_operand.vmem [shape: f32[1,128], index: 4, kind: input, shape index: {}]   ;;  %s662_s5 = inlined_call_operand.hbm [shape: f32[16,128], index: 5, kind: output, shape index: {}]  }
   0x1   :  { %11 = vsyncpa [#allocation6], 0 }
   0x2   :  { %12 = vsyncpa [#allocation4], 0  ;;  %s553_s18 = smov [#allocation5]   ;;  %s459_s22 = scalar_lea.hbm %s658_s1, 4096 }
   0x3   :  { %s30_s19 = sshll.u32 %s553_s18, 4  ;;  %p460_p0 = scmp.ne.s32.totalorder %s658_s1, %s459_s22  ;;  %s31_s19 = int_to_ptr.vmem [resolvable:$true] %s30_s19 }
   0x4   :  { %p463_p1 = scmp.lt.u32.totalorder %s459_s22, %s658_s1 }
   0x6   :  { %p465_p2 = pnand %p463_p1, %p460_p0 }
   0x8   :  { %468 = shalt.err (!%p465_p2)
}
   0x9   :  { %s469_s27 = scalar_lea.vmem %s31_s19, 4096  ;;  %p474_p4 = scmp.lt.s32.totalorder %s31_s19, %s31_s19 }
   0xa   :  { %p470_p3 = scmp.ne.s32.totalorder %s31_s19, %s469_s27  ;;  %p475_p5 = scmp.lt.s32.totalorder %s469_s27, %s469_s27 }
   0xc   :  { %p476_p6 = por %p475_p5, %p474_p4 }
   0xe   :  { %p477_p7 = pnand %p476_p6, %p470_p3 }
  0x10   :  { %480 = shalt.err (!%p477_p7)
}
  0x11   :  { %s554_s28 = smov 256   ;;  %s555_s29 = smov 16  }
  0x12   :  { %36 = dma.hbm_to_vmem [thread:$0]  %s658_s1, 4096, %s31_s19, [#allocation6], %s554_s28, %s554_s28, %s555_s29  }
  0x13   :  { %s556_s7 = smov [#allocation2]   ;;  %s481_s11 = scalar_lea.hbm %s657_s0, 256 }
  0x14   :  { %s18_s8 = sshll.u32 %s556_s7, 4  ;;  %p482_p8 = scmp.ne.s32.totalorder %s657_s0, %s481_s11  ;;  %s19_s8 = int_to_ptr.vmem [resolvable:$true] %s18_s8 }
  0x15   :  { %p485_p9 = scmp.lt.u32.totalorder %s481_s11, %s657_s0 }
  0x17   :  { %p487_p10 = pnand %p485_p9, %p482_p8 }
  0x19   :  { %490 = shalt.err (!%p487_p10)
}
  0x1a   :  { %s491_s16 = scalar_lea.vmem %s19_s8, 256  ;;  %p496_p12 = scmp.lt.s32.totalorder %s19_s8, %s19_s8 }
  0x1b   :  { %p492_p11 = scmp.ne.s32.totalorder %s19_s8, %s491_s16  ;;  %p497_p13 = scmp.lt.s32.totalorder %s491_s16, %s491_s16 }
  0x1d   :  { %p498_p0 = por %p497_p13, %p496_p12 }
  0x1f   :  { %p499_p1 = pnand %p498_p0, %p492_p11 }
  0x21   :  { %502 = shalt.err (!%p499_p1)
}
  0x22   :  { %s557_s1 = smov 128   ;;  %s558_s17 = smov 8  }
  0x23   :  { %24 = dma.hbm_to_vmem [thread:$0]  %s657_s0, 256, %s19_s8, [#allocation3], %s557_s1, %s557_s1, %s558_s17  }
  0x24   :  { %s559_s20 = smov [#allocation7]   ;;  %s503_s24 = scalar_lea.hbm %s660_s3, 4096 }
  0x25   :  { %s44_s21 = sshll.u32 %s559_s20, 4  ;;  %p504_p2 = scmp.ne.s32.totalorder %s660_s3, %s503_s24  ;;  %s45_s21 = int_to_ptr.vmem [resolvable:$true] %s44_s21 }
  0x26   :  { %p507_p3 = scmp.lt.u32.totalorder %s503_s24, %s660_s3 }
  0x28   :  { %p509_p4 = pnand %p507_p3, %p504_p2 }
  0x2a   :  { %512 = shalt.err (!%p509_p4)
}
  0x2b   :  { %s513_s29 = scalar_lea.vmem %s45_s21, 4096  ;;  %p518_p6 = scmp.lt.s32.totalorder %s45_s21, %s45_s21 }
  0x2c   :  { %p514_p5 = scmp.ne.s32.totalorder %s45_s21, %s513_s29  ;;  %p519_p7 = scmp.lt.s32.totalorder %s513_s29, %s513_s29 }
  0x2e   :  { %p520_p8 = por %p519_p7, %p518_p6 }
  0x30   :  { %p521_p9 = pnand %p520_p8, %p514_p5 }
  0x32   :  { %524 = shalt.err (!%p521_p9)
}
  0x33   :  { %50 = dma.hbm_to_vmem [thread:$0]  %s660_s3, 4096, %s45_s21, [#allocation6], %s557_s1, %s557_s1, %s558_s17  }
  0x34   :  { %547 = dma.done.wait [#allocation3], 256  }
  0x35   :  { %548 = vsyncadd [#allocation3], 4294967040 }
  0x36   :  { %549 = dma.done.wait [#allocation6], 8192  }
  0x37   :  { %550 = vsyncadd [#allocation6], 4294959104  ;;  %v560_v0 = vmov 0.0   ;;  %v65_v1 = vld [vmem:[#allocation5 + $0x8] sm:$0xff]  ;;  %v67_v2 = vld [vmem:[#allocation5 + $0x18] sm:$0xff]  ;;  %s561_s8 = smov [#allocation8]  }
  0x38   :  { %172 = vmatprep.mubr.f32.mxu0 %v560_v0  ;;  %v64_v3 = vld [vmem:[#allocation5] sm:$0xff]  ;;  %v378_v4 = vpack.c.bf16 %v67_v2, %v65_v1  ;;  %v66_v5 = vld [vmem:[#allocation5 + $0x10] sm:$0xff]  ;;  %v69_v6 = vld [vmem:[#allocation5 + $0x28] sm:$0xff]  ;;  %s326_s9 = sshll.u32 %s561_s8, 4  ;;  %s327_s9 = int_to_ptr.vmem [resolvable:$true] %s326_s9 }
  0x39   :  { %v71_v7 = vld [vmem:[#allocation5 + $0x38] sm:$0xff]  ;;  %v380_v8 = vpack.c.bf16 %v66_v5, %v64_v3  ;;  %v68_v10 = vld [vmem:[#allocation5 + $0x20] sm:$0xff]  ;;  %v70_v11 = vld [vmem:[#allocation5 + $0x30] sm:$0xff]  ;;  %s525_s10 = scalar_lea.vmem %s327_s9, 256  ;;  %p530_p11 = scmp.lt.s32.totalorder %s327_s9, %s327_s9 }
  0x3a   :  { %v382_v9 = vpack.c.bf16 %v71_v7, %v69_v6  ;;  %v73_v12 = vld [vmem:[#allocation5 + $0x48] sm:$0xff]  ;;  %379 = vmatprep.subr.bf16.mxu0 %v378_v4  ;;  %v75_v13 = vld [vmem:[#allocation5 + $0x58] sm:$0xff]  ;;  %v384_v14 = vpack.c.bf16 %v70_v11, %v68_v10  ;;  %v72_v16 = vld [vmem:[#allocation5 + $0x40] sm:$0xff]  ;;  %p526_p10 = scmp.ne.s32.totalorder %s327_s9, %s525_s10  ;;  %p531_p12 = scmp.lt.s32.totalorder %s525_s10, %s525_s10 }
  0x3b   :  { %381 = vmatpush1.bf16.msra.mxu0 %v380_v8  ;;  %v386_v15 = vpack.c.bf16 %v75_v13, %v73_v12  ;;  %v74_v17 = vld [vmem:[#allocation5 + $0x50] sm:$0xff]  ;;  %v77_v18 = vld [vmem:[#allocation5 + $0x68] sm:$0xff]  ;;  %v79_v19 = vld [vmem:[#allocation5 + $0x78] sm:$0xff] }
  0x3c   :  { %383 = vmatprep.subr.bf16.mxu0 %v382_v9  ;;  %v388_v20 = vpack.c.bf16 %v74_v17, %v72_v16  ;;  %v390_v21 = vpack.c.bf16 %v79_v19, %v77_v18  ;;  %v76_v22 = vld [vmem:[#allocation5 + $0x60] sm:$0xff]  ;;  %v78_v23 = vld [vmem:[#allocation5 + $0x70] sm:$0xff]  ;;  %v81_v24 = vld [vmem:[#allocation5 + $0x88] sm:$0xff]  ;;  %p532_p13 = por %p531_p12, %p530_p11 }
  0x3d   :  { %v83_v25 = vld [vmem:[#allocation5 + $0x98] sm:$0xff]  ;;  %v80_v26 = vld [vmem:[#allocation5 + $0x80] sm:$0xff]  ;;  %v82_v27 = vld [vmem:[#allocation5 + $0x90] sm:$0xff]  ;;  %v392_v30 = vpack.c.bf16 %v78_v23, %v76_v22 }
  0x3e   :  { %v221_v28 = vld [vmem:[#allocation7 + $0x80] sm:$0xff]  ;;  %v222_v29 = vld [vmem:[#allocation7 + $0x88] sm:$0xff]  ;;  %v223_v35 = vld [vmem:[#allocation7 + $0x90] sm:$0xff]  ;;  %v394_v36 = vpack.c.bf16 %v83_v25, %v81_v24  ;;  %v396_v46 = vpack.c.bf16 %v82_v27, %v80_v26  ;;  %p533_p0 = pnand %p532_p13, %p526_p10 }
  0x3f   :  { %385 = vmatpush1.bf16.msra.mxu0 %v384_v14  ;;  %v85_v31 = vld [vmem:[#allocation5 + $0xa8] sm:$0xff]  ;;  %v410_v32 = vpack.c.bf16 %v222_v29, %v221_v28  ;;  %v205_v33 = vld [vmem:[#allocation7] sm:$0xff]  ;;  %v224_v38 = vld [vmem:[#allocation7 + $0x98] sm:$0xff] }
  0x40   :  { %387 = vmatprep.subr.bf16.mxu0 %v386_v15  ;;  %v206_v34 = vld [vmem:[#allocation7 + $0x8] sm:$0xff]  ;;  %v207_v39 = vld [vmem:[#allocation7 + $0x10] sm:$0xff]  ;;  %v208_v40 = vld [vmem:[#allocation7 + $0x18] sm:$0xff]  ;;  %v414_v42 = vpack.c.bf16 %v224_v38, %v223_v35  ;;  %v98_v35 = vlaneseq }
  0x41   :  { %v412_v37 = vpack.c.bf16 %v206_v34, %v205_v33  ;;  %v87_v41 = vld [vmem:[#allocation5 + $0xb8] sm:$0xff]  ;;  %411 = vmatprep.subr.bf16.mxu1 %v410_v32  ;;  %v225_v43 = vld [vmem:[#allocation7 + $0xa0] sm:$0xff]  ;;  %v226_v44 = vld [vmem:[#allocation7 + $0xa8] sm:$0xff]  ;;  %v416_v45 = vpack.c.bf16 %v208_v40, %v207_v39 }
  0x42   :  { %v418_v47 = vpack.c.bf16 %v226_v44, %v225_v43  ;;  %v209_v48 = vld [vmem:[#allocation7 + $0x20] sm:$0xff]  ;;  %v210_v49 = vld [vmem:[#allocation7 + $0x28] sm:$0xff]  ;;  %v398_v50 = vpack.c.bf16 %v87_v41, %v85_v31  ;;  %v86_v52 = vld [vmem:[#allocation5 + $0xb0] sm:$0xff] }
  0x43   :  { %389 = vmatpush1.bf16.msra.mxu0 %v388_v20  ;;  %413 = vmatpush3.bf16.msra.mxu1 %v412_v37  ;;  %v84_v51 = vld [vmem:[#allocation5 + $0xa0] sm:$0xff]  ;;  %v89_v53 = vld [vmem:[#allocation5 + $0xc8] sm:$0xff]  ;;  %v91_v54 = vld [vmem:[#allocation5 + $0xd8] sm:$0xff]  ;;  %v420_v55 = vpack.c.bf16 %v210_v49, %v209_v48 }
  0x44   :  { %391 = vmatprep.subr.bf16.mxu0 %v390_v21  ;;  %415 = vmatprep.subr.bf16.mxu1 %v414_v42  ;;  %v400_v56 = vpack.c.bf16 %v86_v52, %v84_v51  ;;  %v402_v57 = vpack.c.bf16 %v91_v54, %v89_v53  ;;  %v88_v58 = vld [vmem:[#allocation5 + $0xc0] sm:$0xff]  ;;  %v90_v59 = vld [vmem:[#allocation5 + $0xd0] sm:$0xff]  ;;  %v93_v60 = vld [vmem:[#allocation5 + $0xe8] sm:$0xff] }
  0x45   :  { %v95_v61 = vld [vmem:[#allocation5 + $0xf8] sm:$0xff]  ;;  %v404_v62 = vpack.c.bf16 %v90_v59, %v88_v58  ;;  %v92_v1 = vld [vmem:[#allocation5 + $0xe0] sm:$0xff]  ;;  %v94_v2 = vld [vmem:[#allocation5 + $0xf0] sm:$0xff] }
  0x46   :  { %v406_v63 = vpack.c.bf16 %v95_v61, %v93_v60  ;;  %v408_v3 = vpack.c.bf16 %v94_v2, %v92_v1  ;;  %v62_v4 = vld [vmem:[#allocation2] sm:$0xff]  ;;  %v63_v5 = vld [vmem:[#allocation2 + $0x8] sm:$0xff]  ;;  %v229_v12 = vld [vmem:[#allocation7 + $0xc0] sm:$0xff] }
  0x47   :  { %393 = vmatpush1.bf16.msra.mxu0 %v392_v30  ;;  %417 = vmatpush3.bf16.msra.mxu1 %v416_v45  ;;  %v227_v6 = vld [vmem:[#allocation7 + $0xb0] sm:$0xff]  ;;  %v228_v7 = vld [vmem:[#allocation7 + $0xb8] sm:$0xff]  ;;  %v230_v13 = vld [vmem:[#allocation7 + $0xc8] sm:$0xff] }
  0x48   :  { %395 = vmatprep.subr.bf16.mxu0 %v394_v36  ;;  %419 = vmatprep.subr.bf16.mxu1 %v418_v47  ;;  %v422_v8 = vpack.c.bf16 %v228_v7, %v227_v6  ;;  %v211_v9 = vld [vmem:[#allocation7 + $0x30] sm:$0xff]  ;;  %v212_v10 = vld [vmem:[#allocation7 + $0x38] sm:$0xff]  ;;  %v426_v14 = vpack.c.bf16 %v230_v13, %v229_v12  ;;  %v213_v15 = vld [vmem:[#allocation7 + $0x40] sm:$0xff]  ;;  %v99_v36 = vshrl.u32 %v98_v35, 7 }
  0x49   :  { %v424_v11 = vpack.c.bf16 %v212_v10, %v211_v9  ;;  %v214_v16 = vld [vmem:[#allocation7 + $0x48] sm:$0xff]  ;;  %v231_v18 = vld [vmem:[#allocation7 + $0xd0] sm:$0xff]  ;;  %v216_v21 = vld [vmem:[#allocation7 + $0x58] sm:$0xff] }
  0x4a   :  { %v428_v17 = vpack.c.bf16 %v214_v16, %v213_v15  ;;  %v215_v20 = vld [vmem:[#allocation7 + $0x50] sm:$0xff]  ;;  %v233_v23 = vld [vmem:[#allocation7 + $0xe0] sm:$0xff]  ;;  %v234_v24 = vld [vmem:[#allocation7 + $0xe8] sm:$0xff]  ;;  %v100_v37 = vsub.s32 0, %v99_v36  ;;  %v104_v39 = vsub.s32 1, %v99_v36 }
  0x4b   :  { %397 = vmatpush1.bf16.msra.mxu0 %v396_v46  ;;  %421 = vmatpush3.bf16.msra.mxu1 %v420_v55  ;;  %v432_v22 = vpack.c.bf16 %v216_v21, %v215_v20  ;;  %v434_v25 = vpack.c.bf16 %v234_v24, %v233_v23  ;;  %v217_v26 = vld [vmem:[#allocation7 + $0x60] sm:$0xff]  ;;  %v218_v27 = vld [vmem:[#allocation7 + $0x68] sm:$0xff]  ;;  %v235_v29 = vld [vmem:[#allocation7 + $0xf0] sm:$0xff] }
  0x4c   :  { %399 = vmatprep.subr.bf16.mxu0 %v398_v50  ;;  %423 = vmatprep.subr.bf16.mxu1 %v422_v8  ;;  %v436_v28 = vpack.c.bf16 %v218_v27, %v217_v26  ;;  %v236_v30 = vld [vmem:[#allocation7 + $0xf8] sm:$0xff]  ;;  %v219_v32 = vld [vmem:[#allocation7 + $0x70] sm:$0xff] }
  0x4d   :  { %v438_v31 = vpack.c.bf16 %v236_v30, %v235_v29  ;;  %v220_v33 = vld [vmem:[#allocation7 + $0x78] sm:$0xff]  ;;  %v96_v38 = vld [vmem:[%s659_s2] sm:$0x3] }
  0x4e   :  { %v440_v34 = vpack.c.bf16 %v220_v33, %v219_v32  ;;  %v101_v40 = vrot.slane %v96_v38, %v100_v37  ;;  %v105_v41 = vrot.slane %v96_v38, %v104_v39  ;;  %v339_v8 = vld [vmem:[%s661_s4] ss:$0 sm:$0xff] }
  0x4f   :  { %401 = vmatpush1.bf16.msra.mxu0 %v400_v56  ;;  %425 = vmatpush3.bf16.msra.mxu1 %v424_v11 }
  0x50   :  { %403 = vmatprep.subr.bf16.mxu0 %v402_v57  ;;  %427 = vmatprep.subr.bf16.mxu1 %v426_v14 }
  0x53   :  { %405 = vmatpush1.bf16.msra.mxu0 %v404_v62  ;;  %429 = vmatpush3.bf16.msra.mxu1 %v428_v17 }
  0x54   :  { %407 = vmatprep.subr.bf16.mxu0 %v406_v63 }
  0x57   :  { %409 = vmatpush1.bf16.msra.mxu0 %v408_v3 }
  0x5a   :  { %173 = vmatmul.mubr.f32.vlgmr.msra.gmra.mrb[0].mxu0 %v62_v4 }
  0x5b   :  { %178 = vmatprep.mubr.f32.mxu0 %v560_v0  ;;  %v232_v0 = vld [vmem:[#allocation7 + $0xd8] sm:$0xff] }
  0x5c   :  { %v430_v19 = vpack.c.bf16 %v232_v0, %v231_v18 }
  0x5e   :  { %179 = vmatmul.mubr.f32.gmra.mrb[2].mxu0 %v63_v5  ;;  %431 = vmatprep.subr.bf16.mxu1 %v430_v19 }
  0x5f   :  { %433 = vmatpush3.bf16.msra.mxu1 %v432_v22 }
  0x60   :  { %435 = vmatprep.subr.bf16.mxu1 %v434_v25 }
  0x63   :  { %437 = vmatpush3.bf16.msra.mxu1 %v436_v28 }
  0x64   :  { %439 = vmatprep.subr.bf16.mxu1 %v438_v31 }
  0x67   :  { %441 = vmatpush3.bf16.msra.mxu1 %v440_v34 }
 0x12d   :  { %v174_v42 = vpop.f32.mrb[0].mxu0 }
 0x12e   :  { %v175_v43 = vadd.f32 %v174_v42, %v101_v40  ;;  %v176_v44 = vpop.f32.mrb[1].mxu0 }
 0x12f   :  { %v177_v45 = vadd.f32 %v176_v44, %v105_v41 }
 0x130   :  { %v189_v46 = vmul.f32 0.70710677, %v175_v43  ;;  %v185_v59 = vmul.f32 0.5, %v175_v43 }
 0x131   :  { %v190_v47 = vmul.f32 0.70710677, %v177_v45  ;;  %v180_v48 = vpop.f32.mrb[2].mxu0  ;;  %v186_v57 = vmul.f32 0.5, %v177_v45 }
 0x132   :  { %451 = verf.f32 %v189_v46  ;;  %v181_v49 = vadd.f32 %v180_v48, %v101_v40  ;;  %v182_v50 = vpop.f32.mrb[3].mxu0 }
 0x133   :  { %453 = verf.f32 %v190_v47  ;;  %v183_v51 = vadd.f32 %v182_v50, %v105_v41 }
 0x134   :  { %v191_v52 = vmul.f32 0.70710677, %v181_v49  ;;  %v187_v4 = vmul.f32 0.5, %v181_v49 }
 0x135   :  { %v192_v53 = vmul.f32 0.70710677, %v183_v51  ;;  %v188_v2 = vmul.f32 0.5, %v183_v51 }
 0x136   :  { %455 = verf.f32 %v191_v52 }
 0x137   :  { %457 = verf.f32 %v192_v53 }
 0x13c   :  { %v452_v54 = vpop.eup %451 }
 0x13d   :  { %v454_v55 = vpop.eup %453  ;;  %v197_v56 = vadd.f32 1.0, %v452_v54 }
 0x13e   :  { %v198_v58 = vadd.f32 1.0, %v454_v55 }
 0x13f   :  { %v201_v1 = vmul.f32 %v197_v56, %v185_v59 }
 0x140   :  { %v456_v60 = vpop.eup %455  ;;  %v202_v61 = vmul.f32 %v198_v58, %v186_v57 }
 0x141   :  { %v458_v62 = vpop.eup %457  ;;  %v199_v63 = vadd.f32 1.0, %v456_v60 }
 0x142   :  { %v200_v3 = vadd.f32 1.0, %v458_v62  ;;  %308 = vmatprep.mubr.f32.mxu1 %v202_v61 }
 0x143   :  { %309 = vmatmul.mubr.f32.vlgmr.msra.gmra.mrb[0].mxu1 %v201_v1  ;;  %v203_v6 = vmul.f32 %v199_v63, %v187_v4 }
 0x144   :  { %v204_v5 = vmul.f32 %v200_v3, %v188_v2 }
 0x146   :  { %313 = vmatprep.mubr.f32.mxu1 %v204_v5 }
 0x147   :  { %314 = vmatmul.mubr.f32.gmra.mrb[2].mxu1 %v203_v6 }
 0x216   :  { %v372_v7 = vpop.f32.mrb[0].mxu1 }
 0x217   :  { %v373_v9 = vpop.f32.mrb[1].mxu1 }
 0x218   :  { %v374_v10 = vadd.f32 %v373_v9, %v372_v7 }
 0x21a   :  { %v311_v11 = vadd.f32 %v374_v10, %v339_v8  ;;  %v375_v12 = vpop.f32.mrb[2].mxu1 }
 0x21b   :  { %v376_v13 = vpop.f32.mrb[3].mxu1 }
 0x21c   :  { %319 = vst [vmem:[#allocation8] sm:$0xff] %v311_v11  ;;  %v377_v14 = vadd.f32 %v376_v13, %v375_v12 }
 0x21e   :  { %v316_v15 = vadd.f32 %v377_v14, %v339_v8 }
 0x220   :  { %320 = vst [vmem:[#allocation8 + $0x8] sm:$0xff] %v316_v15 }
 0x221   :  { %536 = shalt.err (!%p533_p0)
}
 0x222   :  { %s537_s12 = scalar_lea.hbm %s662_s5, 256 }
 0x223   :  { %p538_p1 = scmp.ne.s32.totalorder %s662_s5, %s537_s12  ;;  %p541_p2 = scmp.lt.u32.totalorder %s537_s12, %s662_s5 }
 0x225   :  { %p543_p3 = pnand %p541_p2, %p538_p1 }
 0x227   :  { %546 = shalt.err (!%p543_p3)
}
 0x228   :  { %332 = dma.vmem_to_hbm [thread:$0]  %s327_s9, 256, %s662_s5, [#allocation4], %s557_s1, %s557_s1, %s558_s17  }
 0x229   :  { %551 = dma.done.wait [#allocation4], 256  }
 0x22a   :  { %552 = vsyncadd [#allocation4], 4294967040 }
 0x22b   :  { %336 = vsyncpa [#allocation3], 1 }
 0x22c   :  { %337 = vsyncpa [#allocation6], 1 }
 0x22d   :  { %338 = vsyncpa [#allocation4], 1 }

</bundles_post_ra>
